<compile_context>
chip_gen: v7x
topology: tpu7x:2x2x1
jax: 0.10.0
libtpu: 0.0.40
codegen_flags: <defaults>
</compile_context>

<pallas_src>
import math
from functools import partial

import jax
import jax.numpy as jnp
from jax import lax
from jax.experimental import pallas as pl
from jax.experimental.pallas import tpu as pltpu


# ----------------------------------------------------------------------------
# Kernel
# ----------------------------------------------------------------------------
def temporal_mlp_kernel(x_ref, w1_ref, w23_ref, bw_ref, b4_ref, o_ref,
                        *, mm_dtype, epi_dtype, n_split):
    TB = x_ref.shape[0]
    TBH = TB // n_split

    # Small resident operands: load & cast once per grid step (a few vregs).
    w1 = w1_ref[...].astype(mm_dtype)              # (H, D_in)
    w2 = w23_ref[0].astype(mm_dtype)               # (H, H)
    w3 = w23_ref[1].astype(mm_dtype)               # (H, H)
    bw = bw_ref[...]                                # (H, 4) f32 = [b1 | b2 | b3 | w4]
    b1 = bw[:, 0:1].astype(epi_dtype)
    b2 = bw[:, 1:2].astype(epi_dtype)
    b3 = bw[:, 2:3].astype(epi_dtype)
    w4 = bw[:, 3:4]                                 # (H, 1) f32  (VPU reduction path)
    b4 = b4_ref[0, 0]                               # SMEM scalar

    # (H, K) x (N, K) -> (H, N): contract x's last dim; batch ends up in lanes.
    contract_last = (((1,), (1,)), ((), ()))

    # n_split independent batch sub-tiles (static unroll) -> MXU/VPU overlap.
    for s in range(n_split):
        x = x_ref[s * TBH:(s + 1) * TBH, :].astype(mm_dtype)       # (TBH, D_in)

        # Layer 1: W1 @ x^T  -> (H, TBH), bias + ReLU in epi_dtype.
        h = lax.dot_general(w1, x, contract_last,
                            preferred_element_type=epi_dtype)
        h = jnp.maximum(h + b1, 0)

        # Layer 2
        h = jnp.dot(w2, h.astype(mm_dtype), preferred_element_type=epi_dtype)
        h = jnp.maximum(h + b2, 0)

        # Layer 3
        h = jnp.dot(w3, h.astype(mm_dtype), preferred_element_type=epi_dtype)
        h = jnp.maximum(h + b3, 0)

        # Dropout: identity at inference time (eval mode).
        # Final (H -> 1): f32 VPU multiply + sublane reduce, then stable softplus.
        z = jnp.sum(h.astype(jnp.float32) * w4, axis=0, keepdims=True) + b4
        o_ref[:, s * TBH:(s + 1) * TBH] = jnp.logaddexp(z, 0.0)    # (1, TBH)


# ----------------------------------------------------------------------------
# Wrapper
# ----------------------------------------------------------------------------
def _vpu_supports_bf16():
    """True on v6e / v7x (bf16-native VPU); False on v5e and older / non-TPU."""
    try:
        kind = jax.devices()[0].device_kind.lower()
    except Exception:
        return False
    if any(old in kind for old in ("v2", "v3", "v4", "v5")):
        return False
    return "tpu" in kind


def _pick_batch_tile(B):
    """Lane tile along the batch axis."""
    if B <= 256:
        return B                      # single full-array tile (always layout-legal)
    lanes = 128 * pl.cdiv(B, 128)
    # >= 2 grid steps so both v7x TensorCores get work; multiple of 256 lanes
    # for the 256-wide v6e/v7x MXU; capped at 2048 (per-step overhead is
    # amortized and the double-buffered working set stays ~1-2 MB).
    tb = 256 * pl.cdiv(pl.cdiv(lanes, 2), 256)
    return min(2048, tb)


def temporal_module_forward(x, params, *, use_bf16_matmul=True, bf16_epilogue=None):
    """x: (B, D_in) f32.  params in PyTorch layout (w: (out, in), b: (out,)).

    Returns (B, 1) f32 (eval-mode semantics: dropout is identity).
    """
    B, D_in = x.shape
    H = params["w1"].shape[0]

    if bf16_epilogue is None:
        bf16_epilogue = _vpu_supports_bf16()
    mm_dtype = jnp.bfloat16 if use_bf16_matmul else jnp.float32
    epi_dtype = jnp.bfloat16 if (use_bf16_matmul and bf16_epilogue) else jnp.float32

    TB = _pick_batch_tile(B)
    n_tiles = pl.cdiv(B, TB)
    n_split = 2 if (TB >= 512 and TB % 256 == 0) else 1

    # Packed weight operands (in practice these would be pre-packed once).
    w1 = params["w1"]                                               # (H, D_in) f32
    w23 = jnp.stack([params["w2"], params["w3"]])                   # (2, H, H) f32
    bw = jnp.stack([params["b1"], params["b2"], params["b3"],
                    params["w4"].reshape(H)], axis=-1)              # (H, 4) f32
    b4 = params["b4"].reshape(1, 1).astype(jnp.float32)             # SMEM scalar

    const2 = lambda shape: pl.BlockSpec(shape, lambda i: (0, 0))

    out = pl.pallas_call(
        partial(temporal_mlp_kernel, mm_dtype=mm_dtype,
                epi_dtype=epi_dtype, n_split=n_split),
        out_shape=jax.ShapeDtypeStruct((1, B), jnp.float32),
        grid=(n_tiles,),
        in_specs=[
            pl.BlockSpec((TB, D_in), lambda i: (i, 0)),             # x tile (batch rows)
            const2((H, D_in)),                                      # w1      (resident)
            pl.BlockSpec((2, H, H), lambda i: (0, 0, 0)),           # w2 | w3 (resident)
            const2((H, 4)),                                         # b1|b2|b3|w4 (resident)
            pl.BlockSpec(memory_space=pltpu.MemorySpace.SMEM),      # b4 scalar
        ],
        out_specs=pl.BlockSpec((1, TB), lambda i: (0, i)),          # lane-dense output
        compiler_params=pltpu.CompilerParams(
            dimension_semantics=("parallel",),                      # shard batch over TCs
            vmem_limit_bytes=32 * 1024 * 1024,
        ),
    )(x, w1, w23, bw, b4)

    # (1, B) -> (B, 1): layout-preserving reshape (bitcast under jit), no slice.
    return out.reshape(B, 1)


# ----------------------------------------------------------------------------
# Params / reference
# ----------------------------------------------------------------------------
def init_params(key, input_dim, hidden_dim=64):
    """PyTorch-nn.Linear-like uniform fan-in init; PyTorch layout (out, in)."""
    ks = jax.random.split(key, 8)

    def linear(kw, kb, fan_in, fan_out):
        bound = 1.0 / math.sqrt(fan_in)
        w = jax.random.uniform(kw, (fan_out, fan_in), jnp.float32, -bound, bound)
        b = jax.random.uniform(kb, (fan_out,), jnp.float32, -bound, bound)
        return w, b

    w1, b1 = linear(ks[0], ks[1], input_dim, hidden_dim)
    w2, b2 = linear(ks[2], ks[3], hidden_dim, hidden_dim)
    w3, b3 = linear(ks[4], ks[5], hidden_dim, hidden_dim)
    w4, b4 = linear(ks[6], ks[7], hidden_dim, 1)
    return dict(w1=w1, b1=b1, w2=w2, b2=b2, w3=w3, b3=b3, w4=w4, b4=b4)


def reference_forward(x, p):
    """Pure-JAX reference (PyTorch semantics, eval mode)."""
    h = jax.nn.relu(x @ p["w1"].T + p["b1"])
    h = jax.nn.relu(h @ p["w2"].T + p["b2"])
    h = jax.nn.relu(h @ p["w3"].T + p["b3"])
    z = h @ p["w4"].T + p["b4"]
    return jax.nn.softplus(z)


if __name__ == "__main__":
    INPUT_DIM = 32      # TIME_EMBED_DIM
    HIDDEN = 64
    BATCH = 8

    key = jax.random.PRNGKey(0)
    k_params, k_x, k_big = jax.random.split(key, 3)

    params = init_params(k_params, INPUT_DIM, HIDDEN)
    time_emb = jax.random.normal(k_x, (BATCH, INPUT_DIM), jnp.float32)
    ref = reference_forward(time_emb, params)

    # Exact f32 path (matches PyTorch eval-mode forward).
    out = jax.block_until_ready(
        temporal_module_forward(time_emb, params, use_bf16_matmul=False))
    assert out.shape == (BATCH, 1), out.shape
    assert jnp.allclose(out, ref, atol=1e-4, rtol=1e-5), (
        f"f32 max abs err {jnp.max(jnp.abs(out - ref))}")

    # Default path: bf16 on the MXU (bf16 epilogue auto-enabled on v6e/v7x).
    out_bf16 = jax.block_until_ready(temporal_module_forward(time_emb, params))
    assert out_bf16.shape == (BATCH, 1), out_bf16.shape
    assert jnp.allclose(out_bf16, ref, atol=5e-2, rtol=5e-2), (
        f"bf16 max abs err {jnp.max(jnp.abs(out_bf16 - ref))}")

    # Larger, non-tile-multiple batch: multi-step grid (both v7x TCs busy),
    # partial last tile, and the two-sub-tile interleave path (TB=512, split=2).
    big_x = jax.random.normal(k_big, (1000, INPUT_DIM), jnp.float32)
    ref_big = reference_forward(big_x, params)
    out_big = jax.block_until_ready(
        temporal_module_forward(big_x, params, use_bf16_matmul=False))
    assert out_big.shape == (1000, 1), out_big.shape
    assert jnp.allclose(out_big, ref_big, atol=1e-4, rtol=1e-5), (
        f"big-batch max abs err {jnp.max(jnp.abs(out_big - ref_big))}")

    print("KERNEL_OK")
</pallas_src>

<mosaic_0001>
module attributes {stable_mosaic.version = 11 : i64} {
  func.func @temporal_mlp_kernel(%arg0: i32, %arg1: memref<8x32xf32, #tpu.memory_space<vmem>>, %arg2: memref<64x32xf32, #tpu.memory_space<vmem>>, %arg3: memref<2x64x64xf32, #tpu.memory_space<vmem>>, %arg4: memref<64x4xf32, #tpu.memory_space<vmem>>, %arg5: memref<1x1xf32, #tpu.memory_space<smem>>, %arg6: memref<1x8xf32, #tpu.memory_space<vmem>>) attributes {dimension_semantics = [#tpu.dimension_semantics<parallel>], iteration_bounds = array<i64: 1>, scalar_prefetch = 0 : i64, scratch_operands = 0 : i64, tpu.core_type = #tpu.core_type<tc>, window_params = [{transform_indices = @transform_0, window_bounds = array<i64: 8, 32>}, {pipeline_mode = #tpu.pipeline_mode<synchronous>, transform_indices = @transform_1, window_bounds = array<i64: 64, 32>}, {pipeline_mode = #tpu.pipeline_mode<synchronous>, transform_indices = @transform_2, window_bounds = array<i64: 2, 64, 64>}, {pipeline_mode = #tpu.pipeline_mode<synchronous>, transform_indices = @transform_3, window_bounds = array<i64: 64, 4>}, {transform_indices = @transform_4, window_bounds = array<i64: 1, 1>}, {transform_indices = @transform_5, window_bounds = array<i64: 1, 8>}]} {
    %c0 = arith.constant 0 : index
    %c0_0 = arith.constant 0 : index
    %0 = vector.load %arg2[%c0, %c0_0] : memref<64x32xf32, #tpu.memory_space<vmem>>, vector<64x32xf32>
    %c0_1 = arith.constant 0 : index
    %c0_2 = arith.constant 0 : index
    %c0_3 = arith.constant 0 : index
    %1 = vector.load %arg3[%c0_1, %c0_2, %c0_3] : memref<2x64x64xf32, #tpu.memory_space<vmem>>, vector<1x64x64xf32>
    %2 = vector.shape_cast %1 : vector<1x64x64xf32> to vector<64x64xf32>
    %c1 = arith.constant 1 : index
    %c0_4 = arith.constant 0 : index
    %c0_5 = arith.constant 0 : index
    %3 = vector.load %arg3[%c1, %c0_4, %c0_5] : memref<2x64x64xf32, #tpu.memory_space<vmem>>, vector<1x64x64xf32>
    %4 = vector.shape_cast %3 : vector<1x64x64xf32> to vector<64x64xf32>
    %c0_6 = arith.constant 0 : index
    %c0_7 = arith.constant 0 : index
    %5 = vector.load %arg4[%c0_6, %c0_7] : memref<64x4xf32, #tpu.memory_space<vmem>>, vector<64x4xf32>
    %6 = vector.extract_strided_slice %5 {offsets = [0, 0], sizes = [64, 1], strides = [1, 1]} : vector<64x4xf32> to vector<64x1xf32>
    %7 = vector.extract_strided_slice %5 {offsets = [0, 1], sizes = [64, 1], strides = [1, 1]} : vector<64x4xf32> to vector<64x1xf32>
    %8 = vector.extract_strided_slice %5 {offsets = [0, 2], sizes = [64, 1], strides = [1, 1]} : vector<64x4xf32> to vector<64x1xf32>
    %9 = vector.extract_strided_slice %5 {offsets = [0, 3], sizes = [64, 1], strides = [1, 1]} : vector<64x4xf32> to vector<64x1xf32>
    %c0_8 = arith.constant 0 : index
    %c0_9 = arith.constant 0 : index
    %10 = memref.load %arg5[%c0_8, %c0_9] : memref<1x1xf32, #tpu.memory_space<smem>>
    %c0_10 = arith.constant 0 : index
    %c0_11 = arith.constant 0 : index
    %11 = vector.load %arg1[%c0_10, %c0_11] : memref<8x32xf32, #tpu.memory_space<vmem>>, vector<8x32xf32>
    %cst = arith.constant dense<0.000000e+00> : vector<64x8xf32>
    %12 = tpu.matmul %0, %11, %cst {dimension_numbers = #tpu.dot_dimension_numbers<[1], [1], [0], [0], [0, 0, 1, 0], [], []>} : vector<64x32xf32>, vector<8x32xf32>, vector<64x8xf32> -> vector<64x8xf32>
    %13 = vector.broadcast %6 : vector<64x1xf32> to vector<64x8xf32>
    %14 = arith.addf %12, %13 : vector<64x8xf32>
    %cst_12 = arith.constant 0.000000e+00 : f32
    %15 = vector.broadcast %cst_12 : f32 to vector<64x8xf32>
    %16 = arith.maximumf %14, %15 : vector<64x8xf32>
    %cst_13 = arith.constant dense<0.000000e+00> : vector<64x8xf32>
    %17 = tpu.matmul %2, %16, %cst_13 {dimension_numbers = #tpu.dot_dimension_numbers<[1], [0], [0], [1], [0, 0, 1, 1], [], []>} : vector<64x64xf32>, vector<64x8xf32>, vector<64x8xf32> -> vector<64x8xf32>
    %18 = vector.broadcast %7 : vector<64x1xf32> to vector<64x8xf32>
    %19 = arith.addf %17, %18 : vector<64x8xf32>
    %cst_14 = arith.constant 0.000000e+00 : f32
    %20 = vector.broadcast %cst_14 : f32 to vector<64x8xf32>
    %21 = arith.maximumf %19, %20 : vector<64x8xf32>
    %cst_15 = arith.constant dense<0.000000e+00> : vector<64x8xf32>
    %22 = tpu.matmul %4, %21, %cst_15 {dimension_numbers = #tpu.dot_dimension_numbers<[1], [0], [0], [1], [0, 0, 1, 1], [], []>} : vector<64x64xf32>, vector<64x8xf32>, vector<64x8xf32> -> vector<64x8xf32>
    %23 = vector.broadcast %8 : vector<64x1xf32> to vector<64x8xf32>
    %24 = arith.addf %22, %23 : vector<64x8xf32>
    %cst_16 = arith.constant 0.000000e+00 : f32
    %25 = vector.broadcast %cst_16 : f32 to vector<64x8xf32>
    %26 = arith.maximumf %24, %25 : vector<64x8xf32>
    %27 = vector.broadcast %9 : vector<64x1xf32> to vector<64x8xf32>
    %28 = arith.mulf %26, %27 : vector<64x8xf32>
    %cst_17 = arith.constant dense<0.000000e+00> : vector<8xf32>
    %29 = vector.multi_reduction <add>, %28, %cst_17 [0] : vector<64x8xf32> to vector<8xf32>
    %30 = vector.shape_cast %29 : vector<8xf32> to vector<1x8xf32>
    %31 = vector.broadcast %10 : f32 to vector<1x8xf32>
    %32 = arith.addf %30, %31 : vector<1x8xf32>
    %cst_18 = arith.constant 0.000000e+00 : f32
    %33 = vector.broadcast %cst_18 : f32 to vector<1x8xf32>
    %34 = arith.maximumf %32, %33 : vector<1x8xf32>
    %35 = vector.broadcast %cst_18 : f32 to vector<1x8xf32>
    %36 = arith.subf %32, %35 : vector<1x8xf32>
    %37 = arith.cmpf one, %36, %36 : vector<1x8xf32>
    %38 = vector.broadcast %cst_18 : f32 to vector<1x8xf32>
    %39 = arith.addf %32, %38 : vector<1x8xf32>
    %40 = math.absf %36 : vector<1x8xf32>
    %cst_19 = arith.constant 0.000000e+00 : f32
    %41 = vector.broadcast %cst_19 : f32 to vector<1x8xf32>
    %42 = arith.subf %41, %40 : vector<1x8xf32>
    %43 = math.exp %42 : vector<1x8xf32>
    %44 = math.log1p %43 : vector<1x8xf32>
    %45 = arith.addf %34, %44 : vector<1x8xf32>
    %46 = arith.select %37, %39, %45 : vector<1x8xi1>, vector<1x8xf32>
    %c0_20 = arith.constant 0 : index
    %c0_21 = arith.constant 0 : index
    %47 = vector.load %arg6[%c0_20, %c0_21] : memref<1x8xf32, #tpu.memory_space<vmem>>, vector<1x8xf32>
    tpu.vector_store %arg6[%c0_20, %c0_21], %46 {strides = array<i32>} : memref<1x8xf32, #tpu.memory_space<vmem>>, vector<1x8xf32>,
    return
  }
  func.func @transform_0(%arg0: i32) -> (i32, i32) {
    %c0_i32 = arith.constant 0 : i32
    %c0_i32_0 = arith.constant 0 : i32
    return %arg0, %c0_i32 : i32, i32
  }
  func.func @transform_1(%arg0: i32) -> (i32, i32) {
    %c0_i32 = arith.constant 0 : i32
    %c0_i32_0 = arith.constant 0 : i32
    %c0_i32_1 = arith.constant 0 : i32
    return %c0_i32, %c0_i32_0 : i32, i32
  }
  func.func @transform_2(%arg0: i32) -> (i32, i32, i32) {
    %c0_i32 = arith.constant 0 : i32
    %c0_i32_0 = arith.constant 0 : i32
    %c0_i32_1 = arith.constant 0 : i32
    %c0_i32_2 = arith.constant 0 : i32
    return %c0_i32, %c0_i32_0, %c0_i32_1 : i32, i32, i32
  }
  func.func @transform_3(%arg0: i32) -> (i32, i32) {
    %c0_i32 = arith.constant 0 : i32
    %c0_i32_0 = arith.constant 0 : i32
    %c0_i32_1 = arith.constant 0 : i32
    return %c0_i32, %c0_i32_0 : i32, i32
  }
  func.func @transform_4(%arg0: i32) -> (i32, i32) {
    %c0_i32 = arith.constant 0 : i32
    %c0_i32_0 = arith.constant 0 : i32
    %c0_i32_1 = arith.constant 0 : i32
    return %c0_i32, %c0_i32_0 : i32, i32
  }
  func.func @transform_5(%arg0: i32) -> (i32, i32) {
    %c0_i32 = arith.constant 0 : i32
    %c0_i32_0 = arith.constant 0 : i32
    return %c0_i32, %arg0 : i32, i32
  }
}

</mosaic_0001>

<bundles_post_ra>
// kernel: tpu_custom_call.1
= control target key start
LH: loop header
LB: loop body
LE: loop exit
PB: predicated region body
PF: predicated region fallthrough
CT: control target
= control target key end

     0   :  { %vm97_vm0 = vcmask 261120   ;;  %v894_v3 = vmov 0   ;;  %s1125_s0 = inlined_call_operand.vmem [shape: f32[8,32], index: 0, kind: input, shape index: {}]   ;;  %s1126_s1 = inlined_call_operand.vmem [shape: f32[64,32], index: 1, kind: input, shape index: {}]   ;;  %s1127_s2 = inlined_call_operand.vmem [shape: f32[2,64,64], index: 2, kind: input, shape index: {}]   ;;  %s1128_s3 = inlined_call_operand.vmem [shape: f32[64,4], index: 3, kind: input, shape index: {}]   ;;  %s1129_s4 = inlined_call_operand.<no memory space> [shape: f32[1,1], index: 4, kind: input, shape index: {}]   ;;  %s1130_s5 = inlined_call_operand.hbm [shape: f32[1,8], index: 5, kind: output, shape index: {}]  }
   0x1   :  { %v56_v0 = vld [vmem:[%s1125_s0] sm:$0xff]  ;;  %v23_v2 = vld [vmem:[%s1126_s1 + $0x8] sm:$0xff]  ;;  %856 = vset.pattern.permute.xlu0 %v894_v3  ;;  %v24_v4 = vld [vmem:[%s1126_s1 + $0x10] sm:$0xff]  ;;  %857 = vset.pattern.permute.xlu1 %v894_v3 }
   0x2   :  { %v22_v1 = vld [vmem:[%s1126_s1] sm:$0xff]  ;;  %749 = vmatprep.subr.msk.mxu0 %vm97_vm0, %v56_v0  ;;  %v952_v6 = vld [vmem:[%s1128_s3 + $0x10] sm:$0xff]  ;;  %v960_v7 = vld [vmem:[%s1128_s3 + $0x8] sm:$0xff] }
   0x3   :  { %751 = vmatprep.mubr.msk.f32.mxu0 %vm97_vm0, %v22_v1  ;;  %750 = vmatpush3.xpose.msk.msra.mxu0 %vm97_vm0, %v56_v0  ;;  %v947_v5 = vld [vmem:[%s1128_s3] sm:$0xff]  ;;  %v965_v8 = vld [vmem:[%s1128_s3 + $0x18] sm:$0xff] }
   0x4   :  { %59 = vperm.xlu0 %856, %v947_v5   ;;  %69 = vperm.xlu1 %857, %v952_v6  }
   0x6   :  { %752 = vmatmul.mubr.msk.f32.vlgmr.msra.gmra.mrb[0].mxu0 %vm97_vm0, %v23_v2 }
   0x7   :  { %11 = vsyncpa [#allocation4], 0  ;;  %754 = vmatprep.mubr.msk.f32.mxu0 %vm97_vm0, %v24_v4  ;;  %v25_v9 = vld [vmem:[%s1126_s1 + $0x18] sm:$0xff]  ;;  %v26_v10 = vld [vmem:[%s1126_s1 + $0x20] sm:$0xff]  ;;  %vm270_vm1 = vcmask 523264   ;;  %v895_v19 = vmov 1  }
   0x8   :  { %64 = vperm.xlu0 %856, %v960_v7   ;;  %74 = vperm.xlu1 %857, %v965_v8   ;;  %v980_v11 = vld [vmem:[%s1128_s3 + $0x20] sm:$0xff]  ;;  %v985_v12 = vld [vmem:[%s1128_s3 + $0x28] sm:$0xff]  ;;  %v28_v14 = vld [vmem:[%s1126_s1 + $0x30] sm:$0xff]  ;;  %v896_v0 = vmov 2   ;;  %v897_v1 = vmov 3   ;;  %vm617_vm2 = vcmask 64512  }
   0x9   :  { %v27_v13 = vld [vmem:[%s1126_s1 + $0x28] sm:$0xff]  ;;  %v1000_v15 = vld [vmem:[%s1128_s3 + $0x30] sm:$0xff]  ;;  %v1005_v16 = vld [vmem:[%s1128_s3 + $0x38] sm:$0xff]  ;;  %s898_s28 = smov [#allocation3]   ;;  %vm659_vm4 = vcmask 57344  }
   0xa   :  { %755 = vmatmul.mubr.msk.f32.gmra.mrb[2].mxu0 %vm97_vm0, %v25_v9  ;;  %v29_v17 = vld [vmem:[%s1126_s1 + $0x38] sm:$0xff]  ;;  %v30_v18 = vld [vmem:[%s1127_s2] sm:$0xff]  ;;  %v31_v56 = vld [vmem:[%s1127_s2 + $0x8] sm:$0xff]  ;;  %s667_s29 = sshll.u32 %s898_s28, 4  ;;  %s668_s29 = int_to_ptr.vmem [resolvable:$true] %s667_s29 }
   0xb   :  { %757 = vmatprep.mubr.msk.f32.mxu0 %vm97_vm0, %v26_v10  ;;  %779 = vmatprep.mubr.msk.f32.mxu1 %vm270_vm1, %v30_v18  ;;  %v32_v57 = vld [vmem:[%s1127_s2 + $0x10] sm:$0xff]  ;;  %v33_v58 = vld [vmem:[%s1127_s2 + $0x18] sm:$0xff]  ;;  %v34_v59 = vld [vmem:[%s1127_s2 + $0x20] sm:$0xff]  ;;  %s874_s30 = scalar_lea.vmem %s668_s29, 32  ;;  %p875_p1 = scmp.lt.s32.totalorder %s668_s29, %s668_s29 }
   0xc   :  { %79 = vperm.xlu0 %856, %v980_v11   ;;  %84 = vperm.xlu1 %857, %v985_v12   ;;  %v35_v60 = vld [vmem:[%s1127_s2 + $0x28] sm:$0xff]  ;;  %v36_v61 = vld [vmem:[%s1127_s2 + $0x30] sm:$0xff]  ;;  %v37_v62 = vld [vmem:[%s1127_s2 + $0x38] sm:$0xff] }
   0xd   :  { %v675_v63 = vld [vmem:[%s1127_s2 + $0x40] sm:$0xff] }
   0xe   :  { %758 = vmatmul.mubr.msk.f32.gmra.mrb[4].mxu0 %vm97_vm0, %v27_v13 }
   0xf   :  { %760 = vmatprep.mubr.msk.f32.mxu0 %vm97_vm0, %v28_v14 }
  0x10   :  { %89 = vperm.xlu0 %856, %v1000_v15   ;;  %94 = vperm.xlu1 %857, %v1005_v16  }
  0x12   :  { %761 = vmatmul.mubr.msk.f32.gmra.mrb[6].mxu0 %vm97_vm0, %v29_v17 }
  0x13   :  { %807 = vmatprep.mubr.msk.f32.mxu0 %vm270_vm1, %v675_v63 }
  0x14   :  { %859 = vset.pattern.permute.xlu1 %v895_v19  ;;  %858 = vset.pattern.permute.xlu0 %v895_v19 }
  0x15   :  { %243 = vperm.xlu1 %859, %v960_v7   ;;  %239 = vperm.xlu0 %858, %v947_v5  }
  0x19   :  { %247 = vperm.xlu1 %859, %v952_v6   ;;  %251 = vperm.xlu0 %858, %v965_v8  }
  0x1d   :  { %255 = vperm.xlu1 %859, %v980_v11   ;;  %259 = vperm.xlu0 %858, %v985_v12  }
  0x21   :  { %263 = vperm.xlu1 %859, %v1000_v15   ;;  %267 = vperm.xlu0 %858, %v1005_v16  }
  0x25   :  { %860 = vset.pattern.permute.xlu1 %v896_v0  ;;  %861 = vset.pattern.permute.xlu0 %v896_v0 }
  0x26   :  { %409 = vperm.xlu1 %860, %v947_v5   ;;  %413 = vperm.xlu0 %861, %v960_v7  }
  0x2a   :  { %417 = vperm.xlu1 %860, %v952_v6   ;;  %862 = vset.pattern.permute.xlu0 %v897_v1 }
  0x2b   :  { %578 = vperm.xlu0 %862, %v947_v5  }
  0x2e   :  { %421 = vperm.xlu1 %860, %v965_v8  }
  0x2f   :  { %586 = vperm.xlu0 %862, %v952_v6  }
  0x32   :  { %863 = vset.pattern.permute.xlu1 %v897_v1 }
  0x33   :  { %582 = vperm.xlu1 %863, %v960_v7   ;;  %590 = vperm.xlu0 %862, %v965_v8  }
  0x37   :  { %864 = vset.pattern.permute.xlu1 %v896_v0  ;;  %594 = vperm.xlu0 %862, %v980_v11  }
  0x38   :  { %425 = vperm.xlu1 %864, %v980_v11  }
  0x3b   :  { %598 = vperm.xlu0 %862, %v985_v12  }
  0x3c   :  { %429 = vperm.xlu1 %864, %v985_v12  }
  0x3f   :  { %606 = vperm.xlu0 %862, %v1005_v16  }
  0x40   :  { %433 = vperm.xlu1 %864, %v1000_v15  }
  0x44   :  { %437 = vperm.xlu1 %864, %v1005_v16  }
  0x48   :  { %865 = vset.pattern.permute.xlu1 %v897_v1 }
  0x49   :  { %602 = vperm.xlu1 %865, %v1000_v15  }
  0x83   :  { %v60_v20 = vpop.permute.xlu0 %59  ;;  %v70_v21 = vpop.permute.xlu1 %69 }
  0x87   :  { %v65_v22 = vpop.permute.xlu0 %64  ;;  %v75_v23 = vpop.permute.xlu1 %74 }
  0x8b   :  { %v85_v33 = vpop.permute.xlu1 %84  ;;  %v80_v36 = vpop.permute.xlu0 %79 }
  0x8f   :  { %v95_v45 = vpop.permute.xlu1 %94  ;;  %v90_v48 = vpop.permute.xlu0 %89 }
  0x94   :  { %v240_v2 = vpop.permute.xlu0 %239  ;;  %v244_v3 = vpop.permute.xlu1 %243 }
  0x98   :  { %v252_v4 = vpop.permute.xlu0 %251  ;;  %v248_v6 = vpop.permute.xlu1 %247 }
  0x9c   :  { %v260_v17 = vpop.permute.xlu0 %259  ;;  %v256_v16 = vpop.permute.xlu1 %255 }
  0xd9   :  { %v753_v24 = vpop.f32.mrb[0].mxu0 }
  0xda   :  { %v197_v25 = vadd.f32 %v753_v24, %v65_v22  ;;  %v191_v26 = vpop.f32.mrb[1].mxu0 }
  0xdb   :  { %v192_v27 = vadd.f32 %v191_v26, %v60_v20 }
  0xdc   :  { %v231_v28 = vmax.f32 %v197_v25, 0.0 }
  0xdd   :  { %v230_v29 = vmax.f32 %v192_v27, 0.0  ;;  %v756_v30 = vpop.f32.mrb[2].mxu0  ;;  %v268_v27 = vpop.permute.xlu0 %267 }
  0xde   :  { %v207_v31 = vadd.f32 %v756_v30, %v75_v23  ;;  %v201_v32 = vpop.f32.mrb[3].mxu0  ;;  %v264_v30 = vpop.permute.xlu1 %263 }
  0xdf   :  { %v202_v34 = vadd.f32 %v201_v32, %v70_v21  ;;  %v819_v35 = vpack.c.bf16 %v231_v28, %v230_v29 }
  0xe0   :  { %v233_v37 = vmax.f32 %v207_v31, 0.0 }
  0xe1   :  { %v232_v38 = vmax.f32 %v202_v34, 0.0  ;;  %v759_v39 = vpop.f32.mrb[4].mxu0  ;;  %820 = vmatprep.subr.bf16.mxu1 %v819_v35 }
  0xe2   :  { %v217_v40 = vadd.f32 %v759_v39, %v85_v33  ;;  %v211_v41 = vpop.f32.mrb[5].mxu0  ;;  %822 = vmatpush3.bf16.msra.mxu1 %v819_v35  ;;  %v677_v39 = vld [vmem:[%s1127_s2 + $0x50] sm:$0xff] }
  0xe3   :  { %v823_v42 = vpack.c.bf16 %v233_v37, %v232_v38  ;;  %v212_v43 = vadd.f32 %v211_v41, %v80_v36  ;;  %v676_v38 = vld [vmem:[%s1127_s2 + $0x48] sm:$0xff]  ;;  %v679_v41 = vld [vmem:[%s1127_s2 + $0x60] sm:$0xff] }
  0xe4   :  { %v235_v44 = vmax.f32 %v217_v40, 0.0  ;;  %v678_v40 = vld [vmem:[%s1127_s2 + $0x58] sm:$0xff] }
  0xe5   :  { %v234_v46 = vmax.f32 %v212_v43, 0.0  ;;  %v762_v47 = vpop.f32.mrb[6].mxu0  ;;  %824 = vmatprep.subr.bf16.mxu1 %v823_v42  ;;  %v681_v43 = vld [vmem:[%s1127_s2 + $0x70] sm:$0xff] }
  0xe6   :  { %v227_v49 = vadd.f32 %v762_v47, %v95_v45  ;;  %v221_v50 = vpop.f32.mrb[7].mxu0  ;;  %826 = vmatpush3.bf16.msra.mxu1 %v823_v42  ;;  %v680_v42 = vld [vmem:[%s1127_s2 + $0x68] sm:$0xff]  ;;  %v410_v45 = vpop.permute.xlu1 %409 }
  0xe7   :  { %v827_v51 = vpack.c.bf16 %v235_v44, %v234_v46  ;;  %v222_v52 = vadd.f32 %v221_v50, %v90_v48  ;;  %v682_v44 = vld [vmem:[%s1127_s2 + $0x78] sm:$0xff]  ;;  %v414_v47 = vpop.permute.xlu0 %413 }
  0xe8   :  { %v237_v53 = vmax.f32 %v227_v49, 0.0 }
  0xe9   :  { %v236_v54 = vmax.f32 %v222_v52, 0.0  ;;  %828 = vmatprep.subr.bf16.mxu1 %v827_v51 }
  0xea   :  { %830 = vmatpush3.bf16.msra.mxu1 %v827_v51  ;;  %v418_v46 = vpop.permute.xlu1 %417 }
  0xeb   :  { %v831_v55 = vpack.c.bf16 %v237_v53, %v236_v54  ;;  %v579_v49 = vpop.permute.xlu0 %578 }
  0xed   :  { %832 = vmatprep.subr.bf16.mxu1 %v831_v55 }
  0xee   :  { %834 = vmatpush3.bf16.msra.mxu1 %v831_v55  ;;  %v422_v48 = vpop.permute.xlu1 %421 }
  0xef   :  { %v587_v51 = vpop.permute.xlu0 %586 }
  0xf1   :  { %780 = vmatmul.mubr.msk.f32.vlgmr.msra.gmra.mrb[0].mxu1 %vm270_vm1, %v31_v56 }
  0xf2   :  { %782 = vmatprep.mubr.msk.f32.mxu1 %vm270_vm1, %v32_v57  ;;  %v583_v50 = vpop.permute.xlu1 %582 }
  0xf3   :  { %v591_v53 = vpop.permute.xlu0 %590 }
  0xf5   :  { %783 = vmatmul.mubr.msk.f32.gmra.mrb[2].mxu1 %vm270_vm1, %v33_v58 }
  0xf6   :  { %785 = vmatprep.mubr.msk.f32.mxu1 %vm270_vm1, %v34_v59  ;;  %v426_v52 = vpop.permute.xlu1 %425 }
  0xf9   :  { %786 = vmatmul.mubr.msk.f32.gmra.mrb[4].mxu1 %vm270_vm1, %v35_v60  ;;  %v595_v60 = vpop.permute.xlu0 %594 }
  0xfa   :  { %788 = vmatprep.mubr.msk.f32.mxu1 %vm270_vm1, %v36_v61  ;;  %v430_v54 = vpop.permute.xlu1 %429 }
  0xfd   :  { %789 = vmatmul.mubr.msk.f32.gmra.mrb[6].mxu1 %vm270_vm1, %v37_v62 }
  0xfe   :  { %v434_v63 = vpop.permute.xlu1 %433 }
 0x1c4   :  { %v781_v5 = vpop.f32.mrb[0].mxu1 }
 0x1c5   :  { %v367_v7 = vadd.f32 %v781_v5, %v244_v3  ;;  %v361_v8 = vpop.f32.mrb[1].mxu1 }
 0x1c6   :  { %v362_v9 = vadd.f32 %v361_v8, %v240_v2 }
 0x1c7   :  { %v401_v10 = vmax.f32 %v367_v7, 0.0 }
 0x1c8   :  { %v400_v11 = vmax.f32 %v362_v9, 0.0  ;;  %v784_v12 = vpop.f32.mrb[2].mxu1 }
 0x1c9   :  { %v377_v13 = vadd.f32 %v784_v12, %v252_v4  ;;  %v371_v14 = vpop.f32.mrb[3].mxu1 }
 0x1ca   :  { %v835_v18 = vpack.c.bf16 %v401_v10, %v400_v11  ;;  %v372_v19 = vadd.f32 %v371_v14, %v248_v6 }
 0x1cb   :  { %v403_v20 = vmax.f32 %v377_v13, 0.0 }
 0x1cc   :  { %v402_v21 = vmax.f32 %v372_v19, 0.0  ;;  %v787_v15 = vpop.f32.mrb[4].mxu1  ;;  %836 = vmatprep.subr.bf16.mxu0 %v835_v18  ;;  %v438_v19 = vpop.permute.xlu1 %437 }
 0x1cd   :  { %v387_v22 = vadd.f32 %v787_v15, %v260_v17  ;;  %v381_v23 = vpop.f32.mrb[5].mxu1  ;;  %838 = vmatpush3.bf16.msra.mxu0 %v835_v18  ;;  %v599_v18 = vpop.permute.xlu0 %598 }
 0x1ce   :  { %v839_v24 = vpack.c.bf16 %v403_v20, %v402_v21  ;;  %v382_v25 = vadd.f32 %v381_v23, %v256_v16 }
 0x1cf   :  { %v405_v26 = vmax.f32 %v387_v22, 0.0 }
 0x1d0   :  { %v404_v28 = vmax.f32 %v382_v25, 0.0  ;;  %v790_v29 = vpop.f32.mrb[6].mxu1  ;;  %840 = vmatprep.subr.bf16.mxu0 %v839_v24 }
 0x1d1   :  { %v397_v31 = vadd.f32 %v790_v29, %v268_v27  ;;  %v391_v32 = vpop.f32.mrb[7].mxu1  ;;  %842 = vmatpush3.bf16.msra.mxu0 %v839_v24 }
 0x1d2   :  { %v843_v33 = vpack.c.bf16 %v405_v26, %v404_v28  ;;  %v392_v34 = vadd.f32 %v391_v32, %v264_v30 }
 0x1d3   :  { %v407_v35 = vmax.f32 %v397_v31, 0.0  ;;  %v603_v31 = vpop.permute.xlu1 %602 }
 0x1d4   :  { %v406_v36 = vmax.f32 %v392_v34, 0.0  ;;  %844 = vmatprep.subr.bf16.mxu0 %v843_v33  ;;  %v607_v34 = vpop.permute.xlu0 %606 }
 0x1d5   :  { %846 = vmatpush3.bf16.msra.mxu0 %v843_v33 }
 0x1d6   :  { %v847_v37 = vpack.c.bf16 %v407_v35, %v406_v36 }
 0x1d8   :  { %848 = vmatprep.subr.bf16.mxu0 %v847_v37 }
 0x1d9   :  { %850 = vmatpush3.bf16.msra.mxu0 %v847_v37 }
 0x1dc   :  { %808 = vmatmul.mubr.msk.f32.vlgmr.msra.gmra.mrb[8].mxu0 %vm270_vm1, %v676_v38 }
 0x1dd   :  { %810 = vmatprep.mubr.msk.f32.mxu0 %vm270_vm1, %v677_v39 }
 0x1e0   :  { %811 = vmatmul.mubr.msk.f32.gmra.mrb[10].mxu0 %vm270_vm1, %v678_v40 }
 0x1e1   :  { %813 = vmatprep.mubr.msk.f32.mxu0 %vm270_vm1, %v679_v41 }
 0x1e4   :  { %814 = vmatmul.mubr.msk.f32.gmra.mrb[12].mxu0 %vm270_vm1, %v680_v42 }
 0x1e5   :  { %816 = vmatprep.mubr.msk.f32.mxu0 %vm270_vm1, %v681_v43 }
 0x1e8   :  { %817 = vmatmul.mubr.msk.f32.gmra.mrb[14].mxu0 %vm270_vm1, %v682_v44 }
 0x2af   :  { %v809_v55 = vpop.f32.mrb[8].mxu0 }
 0x2b0   :  { %v536_v56 = vadd.f32 %v809_v55, %v414_v47  ;;  %v530_v57 = vpop.f32.mrb[9].mxu0 }
 0x2b1   :  { %v531_v58 = vadd.f32 %v530_v57, %v410_v45 }
 0x2b2   :  { %v570_v59 = vmax.f32 %v536_v56, 0.0 }
 0x2b3   :  { %v569_v61 = vmax.f32 %v531_v58, 0.0  ;;  %v812_v62 = vpop.f32.mrb[10].mxu0 }
 0x2b4   :  { %v610_v0 = vmul.f32 %v583_v50, %v570_v59  ;;  %v546_v1 = vadd.f32 %v812_v62, %v422_v48  ;;  %v540_v2 = vpop.f32.mrb[11].mxu0 }
 0x2b5   :  { %v609_v3 = vmul.f32 %v579_v49, %v569_v61  ;;  %v541_v4 = vadd.f32 %v540_v2, %v418_v46  ;;  %v639_v49 = vstv %s1129_s4  ;;  %s870_s4 = scalar_lea.vmem %s668_s29, 16 }
 0x2b6   :  { %v619_v5 = vsel %vm617_vm2, %v610_v0, 0.0  ;;  %v572_v6 = vmax.f32 %v546_v1, 0.0  ;;  %p871_p0 = scmp.ne.s32.totalorder %s668_s29, %s870_s4  ;;  %p876_p2 = scmp.lt.s32.totalorder %s874_s30, %s870_s4 }
 0x2b7   :  { %v618_v7 = vsel %vm617_vm2, %v609_v3, 0.0  ;;  %v571_v8 = vmax.f32 %v541_v4, 0.0  ;;  %v815_v9 = vpop.f32.mrb[12].mxu0 }
 0x2b8   :  { %v620_v10 = vadd.f32 %v619_v5, %v618_v7  ;;  %v556_v11 = vadd.f32 %v815_v9, %v430_v54  ;;  %v550_v12 = vpop.f32.mrb[13].mxu0  ;;  %v612_v13 = vmul.f32 %v591_v53, %v572_v6  ;;  %p877_p3 = por %p876_p2, %p875_p1 }
 0x2b9   :  { %v611_v14 = vmul.f32 %v587_v51, %v571_v8  ;;  %v551_v17 = vadd.f32 %v550_v12, %v426_v52 }
 0x2ba   :  { %v574_v16 = vmax.f32 %v556_v11, 0.0  ;;  %v623_v25 = vsel %vm617_vm2, %v612_v13, 0.0  ;;  %p878_p4 = pnand %p877_p3, %p871_p0 }
 0x2bb   :  { %v621_v20 = vsel %vm617_vm2, %v611_v14, 0.0  ;;  %v573_v21 = vmax.f32 %v551_v17, 0.0  ;;  %v818_v15 = vpop.f32.mrb[14].mxu0 }
 0x2bc   :  { %v622_v22 = vadd.f32 %v621_v20, %v620_v10  ;;  %v566_v23 = vadd.f32 %v818_v15, %v438_v19  ;;  %v560_v24 = vpop.f32.mrb[15].mxu0  ;;  %v614_v26 = vmul.f32 %v599_v18, %v574_v16 }
 0x2bd   :  { %v613_v27 = vmul.f32 %v595_v60, %v573_v21  ;;  %v561_v28 = vadd.f32 %v560_v24, %v434_v63 }
 0x2be   :  { %v624_v29 = vadd.f32 %v623_v25, %v622_v22  ;;  %v576_v30 = vmax.f32 %v566_v23, 0.0  ;;  %v627_v36 = vsel %vm617_vm2, %v614_v26, 0.0 }
 0x2bf   :  { %v625_v32 = vsel %vm617_vm2, %v613_v27, 0.0  ;;  %v575_v33 = vmax.f32 %v561_v28, 0.0 }
 0x2c0   :  { %v626_v35 = vadd.f32 %v625_v32, %v624_v29  ;;  %v616_v37 = vmul.f32 %v607_v34, %v576_v30 }
 0x2c1   :  { %v615_v38 = vmul.f32 %v603_v31, %v575_v33 }
 0x2c2   :  { %v628_v39 = vadd.f32 %v627_v36, %v626_v35  ;;  %v631_v42 = vsel %vm617_vm2, %v616_v37, 0.0 }
 0x2c3   :  { %v629_v40 = vsel %vm617_vm2, %v615_v38, 0.0 }
 0x2c4   :  { %v630_v41 = vadd.f32 %v629_v40, %v628_v39 }
 0x2c6   :  { %v632_v43 = vadd.f32 %v631_v42, %v630_v41 }
 0x2c8   :  { %v633_v44 = vrot.slane %v632_v43, 4 }
 0x2ca   :  { %v634_v45 = vadd.f32 %v633_v44, %v632_v43 }
 0x2cc   :  { %v635_v46 = vrot.slane %v634_v45, 2 }
 0x2ce   :  { %v636_v47 = vadd.f32 %v635_v46, %v634_v45 }
 0x2d0   :  { %v637_v48 = vrot.slane %v636_v47, 1 }
 0x2d2   :  { %v638_v50 = vadd.f32 %v637_v48, %v636_v47 }
 0x2d4   :  { %v640_v51 = vadd.f32 %v639_v49, %v638_v50 }
 0x2d6   :  { %v644_v52 = vand.u32 2147483647, %v640_v51  ;;  %v641_v63 = vmax.f32 %v640_v51, 0.0  ;;  %vm642_vm5 = vcmp.ne.f32.partialorder %v640_v51, %v640_v51 }
 0x2d8   :  { %v645_v53 = vsub.f32 0.0, %v644_v52 }
 0x2da   :  { %v646_v54 = vmul.f32 1.442695, %v645_v53 }
 0x2dc   :  { %866 = vpow2.f32 %v646_v54 }
 0x2e6   :  { %v867_v55 = vpop.eup %866 }
 0x2e7   :  { %v648_v56 = vadd.f32 1.0, %v867_v55  ;;  %v651_v57 = vmul.f32 -0.5, %v867_v55  ;;  %v654_v59 = vand.u32 2147483647, %v867_v55 }
 0x2e9   :  { %868 = vlog2.f32 %v648_v56  ;;  %v652_v58 = vadd.f32 1.0, %v651_v57  ;;  %vm655_vm3 = vcmp.lt.f32.partialorder %v654_v59, 0.0004427343 }
 0x2eb   :  { %v653_v62 = vmul.f32 %v867_v55, %v652_v58 }
 0x2f3   :  { %v869_v60 = vpop.eup %868 }
 0x2f4   :  { %v650_v61 = vmul.f32 0.6931472, %v869_v60 }
 0x2f6   :  { %v656_v0 = vsel %vm655_vm3, %v653_v62, %v650_v61 }
 0x2f7   :  { %v657_v1 = vadd.f32 %v656_v0, %v641_v63 }
 0x2f9   :  { %v658_v2 = vsel %vm642_vm5, %v640_v51, %v657_v1 }
 0x2fa   :  { %660 = vst.msk [vmem:[#allocation3] sm:$0x1] %vm659_vm4, %v658_v2 }
 0x2fb   :  { %881 = shalt.err (!%p878_p4)
}
 0x2fc   :  { %s882_s8 = scalar_lea.hbm %s1130_s5, 16 }
 0x2fd   :  { %p883_p5 = scmp.ne.s32.totalorder %s1130_s5, %s882_s8  ;;  %p886_p6 = scmp.lt.u32.totalorder %s882_s8, %s1130_s5 }
 0x2ff   :  { %p888_p7 = pnand %p886_p6, %p883_p5 }
 0x301   :  { %891 = shalt.err (!%p888_p7)
}
 0x302   :  { %670 = dma.vmem_to_hbm [thread:$0]  %s668_s29, 16, %s1130_s5, [#allocation4]  }
 0x303   :  { %892 = dma.done.wait [#allocation4], 16  }
 0x304   :  { %893 = vsyncadd [#allocation4], 4294967280 }
 0x305   :  { %674 = vsyncpa [#allocation4], 1 }

</bundles_post_ra>
